<compile_context>
chip_gen: v6e
topology: v6e:2x2x1
jax: 0.10.0
libtpu: 0.0.40
codegen_flags: <defaults>
</compile_context>

<pallas_src>
import functools

import jax
import jax.numpy as jnp
from jax.experimental import pallas as pl
from jax.experimental.pallas import tpu as pltpu


# ----------------------------- Pallas kernel --------------------------------
def mgnn4_kernel(a_ref, x_ref, wgc_ref, bcat_ref, mask_ref, wcls_ref, bl_ref,
                 out_ref, *, n_nodes, hidden, n_classes, n_branches):
    # a_ref   : (B*N, N)   f32   branch-stacked normalized adjacency
    # x_ref   : (N, F)     f32   node features
    # wgc_ref : (F, B*H)   bf16  fused GCN weights
    # bcat_ref: (1, B*H)   f32   fused GCN biases
    # mask_ref: (B*N, B*H) f32   block-diagonal 0/1 selector
    # wcls_ref: (B*H, Cp)  bf16  classifier, zero-padded + vertically tiled B times
    # bl_ref  : (1, Cp)    f32   classifier bias (zero-padded)
    # out_ref : (N, Cp)    f32   lane-dense log-softmax slab

    # Aggregation: one MXU push for all 4 branches ((A@X)@W association,
    # cheaper than A@(X@W) because F < H).  f32 operands: free at toy size.
    ax = jnp.dot(a_ref[...], x_ref[...],
                 preferred_element_type=jnp.float32)              # (B*N, F) f32

    # One bf16 cast of the whole AX slab, then one lane-dense weight push that
    # covers every branch (block (i, j) = A_i X W_j).
    axw = jnp.dot(ax.astype(jnp.bfloat16), wgc_ref[...],
                  preferred_element_type=jnp.float32)             # (B*N, B*H) f32

    # Bias + per-branch ReLU; block-diagonal mask keeps only the (i, i) blocks.
    # Dropout = eval-mode identity.
    h = mask_ref[...] * jnp.maximum(axw + bcat_ref[...], 0.0)     # (B*N, B*H)

    # Reduce the branch (sublane-block) axis -> (N, B*H) lane-dense.
    acc = h[0:n_nodes, :]
    for i in range(1, n_branches):                                # static unroll
        acc = acc + h[i * n_nodes:(i + 1) * n_nodes, :]

    # Classifier: the 4x-tiled W_cls absorbs the sum over branches; the outer
    # ReLU of a sum of ReLUs is a no-op and is dropped.
    logits = jnp.dot(acc.astype(jnp.bfloat16), wcls_ref[...],
                     preferred_element_type=jnp.float32) + bl_ref[...]  # (N, Cp)

    # log_softmax over the C real classes; padded lanes excluded from the max
    # (-inf) and from the exp-sum (exp(-inf) == 0 -> no overflow path).
    lane = jax.lax.broadcasted_iota(jnp.int32, logits.shape, 1)
    valid = lane < n_classes
    m = jnp.max(jnp.where(valid, logits, -jnp.inf), axis=1, keepdims=True)
    z = logits - m
    p = jnp.exp(jnp.where(valid, z, -jnp.inf))
    lse = jnp.log(jnp.sum(p, axis=1, keepdims=True))
    out_ref[...] = (z - lse).astype(out_ref.dtype)   # full lane-dense store


# ------------------------------ wrapper --------------------------------------
def mgnn4_pallas(a_stack, x, wg_stack, bg_stack, w_lin, b_lin):
    n_branches, n_nodes, _ = a_stack.shape
    f_in = x.shape[1]
    hidden = wg_stack.shape[2]
    n_classes = w_lin.shape[1]
    c_pad = ((n_classes + 127) // 128) * 128  # lane-dense logits/output width

    # Lane-density / alignment guards (fail loudly instead of silently
    # relayouting if the fused widths stop being vreg-friendly).
    assert (n_branches * hidden) % 128 == 0, \
        "fused GCN width n_branches*hidden must be a multiple of 128 lanes"
    assert n_nodes % 8 == 0, \
        "n_nodes must be a multiple of 8 sublanes for the branch-stacked layout"

    # Branch-stacked adjacency: rows [i*N, (i+1)*N) hold A_i (dst-major).
    a_stk = a_stack.reshape(n_branches * n_nodes, n_nodes).astype(jnp.float32)

    # Fused lane-dense GCN weight (F, B*H): branch i occupies lanes i*H:(i+1)*H.
    wg_cat = jnp.transpose(wg_stack, (1, 0, 2)).reshape(f_in, n_branches * hidden)
    # Fused GCN bias (1, B*H), same lane layout.
    b_cat = bg_stack.reshape(1, n_branches * hidden).astype(jnp.float32)

    # Block-diagonal selector: (row-block i) x (lane-block i) -> 1.
    row_b = jnp.arange(n_branches * n_nodes) // n_nodes
    col_b = jnp.arange(n_branches * hidden) // hidden
    diag_mask = (row_b[:, None] == col_b[None, :]).astype(jnp.float32)

    # Classifier: zero-pad classes to 128 lanes, tile vertically B times so the
    # final matmul also performs the sum over branches.
    wl_pad = jnp.zeros((hidden, c_pad), jnp.float32).at[:, :n_classes].set(w_lin)
    w_cls = jnp.tile(wl_pad, (n_branches, 1))
    bl_pad = jnp.zeros((1, c_pad), jnp.float32).at[:, :n_classes].set(b_lin)

    # f32 for the precision-sensitive A@X stage (free at toy size); bf16 for
    # the lane-dense weight pushes (f32 accumulation inside the kernel).
    x_f32 = x.astype(jnp.float32)
    wgc_bf = wg_cat.astype(jnp.bfloat16)
    wcls_bf = w_cls.astype(jnp.bfloat16)

    operands = (a_stk, x_f32, wgc_bf, b_cat, diag_mask, wcls_bf, bl_pad)

    flops = int(2 * n_branches * n_nodes * n_nodes * f_in                  # A @ X
                + 2 * n_branches * n_nodes * f_in * n_branches * hidden   # AX @ Wcat
                + 2 * n_nodes * n_branches * hidden * c_pad)              # acc @ Wcls
    transcendentals = int(n_nodes * c_pad + n_nodes)
    bytes_accessed = int(sum(int(t.size) * t.dtype.itemsize for t in operands)
                         + n_nodes * c_pad * 4)

    kernel = functools.partial(mgnn4_kernel, n_nodes=n_nodes, hidden=hidden,
                               n_classes=n_classes, n_branches=n_branches)

    out_pad = pl.pallas_call(
        kernel,
        out_shape=jax.ShapeDtypeStruct((n_nodes, c_pad), jnp.float32),
        in_specs=[pl.BlockSpec(memory_space=pltpu.MemorySpace.VMEM)] * len(operands),
        out_specs=pl.BlockSpec(memory_space=pltpu.MemorySpace.VMEM),
        cost_estimate=pl.CostEstimate(flops=flops,
                                      transcendentals=transcendentals,
                                      bytes_accessed=bytes_accessed),
    )(*operands)

    # Lane-dense slab -> real classes (free layout plumbing in the wrapper).
    return out_pad[:, :n_classes]


# ------------------------------- JAX glue ------------------------------------
def gcn_norm_dense(edge_index, edge_weight, num_nodes):
    """Dense normalized adjacency matching PyG GCNConv (add self-loops,
    symmetric sqrt-degree normalization with edge weights)."""
    src = edge_index[0]
    dst = edge_index[1]
    loop = jnp.arange(num_nodes, dtype=src.dtype)
    src = jnp.concatenate([src, loop])
    dst = jnp.concatenate([dst, loop])
    w = jnp.concatenate([edge_weight,
                         jnp.ones((num_nodes,), edge_weight.dtype)])

    deg = jnp.zeros((num_nodes,), jnp.float32).at[dst].add(w)
    dinv = jnp.where(deg > 0, 1.0 / jnp.sqrt(deg), 0.0)
    norm = dinv[src] * w * dinv[dst]

    adj = jnp.zeros((num_nodes, num_nodes), jnp.float32).at[dst, src].add(norm)
    return adj


def mgnn4_reference(a_stack, x, wg_stack, bg_stack, w_lin, b_lin):
    acc = 0.0
    for i in range(4):
        h = a_stack[i] @ (x @ wg_stack[i]) + bg_stack[i]
        acc = acc + jax.nn.relu(h)
    y = jax.nn.relu(acc)
    logits = y @ w_lin + b_lin
    return jax.nn.log_softmax(logits, axis=1)


# --------------------------------- main ---------------------------------------
if __name__ == "__main__":
    N_NODES = 8        # number of graph nodes
    IN_CH = 16         # in_channels
    HIDDEN = 32        # hidden_channels (4 branches -> 128 fused lanes)
    N_CLASSES = 4      # num_classes
    N_EDGES = 12       # edges per edge set

    key = jax.random.PRNGKey(0)
    keys = jax.random.split(key, 16)

    # Node features.
    x = jax.random.normal(keys[0], (N_NODES, IN_CH), jnp.float32)

    # Four deterministic edge sets + positive edge weights.
    edge_indices = []
    edge_weights = []
    for i in range(4):
        src = jax.random.randint(keys[1 + i], (N_EDGES,), 0, N_NODES, jnp.int32)
        dst = jax.random.randint(keys[5 + i], (N_EDGES,), 0, N_NODES, jnp.int32)
        edge_indices.append(jnp.stack([src, dst], axis=0))          # (2, E)
        edge_weights.append(
            jax.random.uniform(keys[9 + i], (N_EDGES,), jnp.float32, 0.1, 1.0))

    # Parameters (deterministic init; shapes follow the module's __init__).
    wg_stack = 0.1 * jax.random.normal(
        keys[13], (4, IN_CH, HIDDEN), jnp.float32)                  # GCNConv weights
    bg_stack = jnp.zeros((4, 1, HIDDEN), jnp.float32)               # GCNConv biases
    w_lin = 0.1 * jax.random.normal(
        keys[14], (HIDDEN, N_CLASSES), jnp.float32)                 # Linear weight (H, C)
    b_lin = 0.01 * jax.random.normal(
        keys[15], (1, N_CLASSES), jnp.float32)                      # Linear bias

    # Build dense normalized adjacencies (glue).
    a_stack = jnp.stack([
        gcn_norm_dense(edge_indices[i], edge_weights[i], N_NODES)
        for i in range(4)
    ], axis=0)                                                      # (4, N, N)

    out = mgnn4_pallas(a_stack, x, wg_stack, bg_stack, w_lin, b_lin)
    out = jax.block_until_ready(out)

    ref = mgnn4_reference(a_stack, x, wg_stack, bg_stack, w_lin, b_lin)
    assert out.shape == (N_NODES, N_CLASSES)
    # bf16 weight matmuls on the MXU -> loosened tolerance vs the f32 reference.
    assert jnp.allclose(out, ref, atol=5e-2, rtol=5e-2), "mismatch vs reference"

    print("KERNEL_OK")
</pallas_src>

<mosaic_0001>
module attributes {stable_mosaic.version = 11 : i64} {
  func.func @mgnn4_kernel(%arg0: memref<32x8xf32, #tpu.memory_space<vmem>>, %arg1: memref<8x16xf32, #tpu.memory_space<vmem>>, %arg2: memref<16x128xbf16, #tpu.memory_space<vmem>>, %arg3: memref<1x128xf32, #tpu.memory_space<vmem>>, %arg4: memref<32x128xf32, #tpu.memory_space<vmem>>, %arg5: memref<128x128xbf16, #tpu.memory_space<vmem>>, %arg6: memref<1x128xf32, #tpu.memory_space<vmem>>, %arg7: memref<8x128xf32, #tpu.memory_space<vmem>>) attributes {dimension_semantics = [], scalar_prefetch = 0 : i64, scratch_operands = 0 : i64, tpu.core_type = #tpu.core_type<tc>} {
    %c0 = arith.constant 0 : index
    %c0_0 = arith.constant 0 : index
    %0 = vector.load %arg0[%c0, %c0_0] : memref<32x8xf32, #tpu.memory_space<vmem>>, vector<32x8xf32>
    %c0_1 = arith.constant 0 : index
    %c0_2 = arith.constant 0 : index
    %1 = vector.load %arg1[%c0_1, %c0_2] : memref<8x16xf32, #tpu.memory_space<vmem>>, vector<8x16xf32>
    %cst = arith.constant dense<0.000000e+00> : vector<32x16xf32>
    %2 = tpu.matmul %0, %1, %cst {dimension_numbers = #tpu.dot_dimension_numbers<[1], [0], [0], [1], [0, 0, 1, 1], [], []>} : vector<32x8xf32>, vector<8x16xf32>, vector<32x16xf32> -> vector<32x16xf32>
    %3 = arith.truncf %2 : vector<32x16xf32> to vector<32x16xbf16>
    %c0_3 = arith.constant 0 : index
    %c0_4 = arith.constant 0 : index
    %4 = vector.load %arg2[%c0_3, %c0_4] : memref<16x128xbf16, #tpu.memory_space<vmem>>, vector<16x128xbf16>
    %cst_5 = arith.constant dense<0.000000e+00> : vector<32x128xf32>
    %5 = tpu.matmul %3, %4, %cst_5 {dimension_numbers = #tpu.dot_dimension_numbers<[1], [0], [0], [1], [0, 0, 1, 1], [], []>} : vector<32x16xbf16>, vector<16x128xbf16>, vector<32x128xf32> -> vector<32x128xf32>
    %c0_6 = arith.constant 0 : index
    %c0_7 = arith.constant 0 : index
    %6 = vector.load %arg4[%c0_6, %c0_7] : memref<32x128xf32, #tpu.memory_space<vmem>>, vector<32x128xf32>
    %c0_8 = arith.constant 0 : index
    %c0_9 = arith.constant 0 : index
    %7 = vector.load %arg3[%c0_8, %c0_9] : memref<1x128xf32, #tpu.memory_space<vmem>>, vector<1x128xf32>
    %8 = vector.broadcast %7 : vector<1x128xf32> to vector<32x128xf32>
    %9 = arith.addf %5, %8 : vector<32x128xf32>
    %cst_10 = arith.constant 0.000000e+00 : f32
    %10 = vector.broadcast %cst_10 : f32 to vector<32x128xf32>
    %11 = arith.maximumf %9, %10 : vector<32x128xf32>
    %12 = arith.mulf %6, %11 : vector<32x128xf32>
    %13 = vector.extract_strided_slice %12 {offsets = [0, 0], sizes = [8, 128], strides = [1, 1]} : vector<32x128xf32> to vector<8x128xf32>
    %14 = vector.extract_strided_slice %12 {offsets = [8, 0], sizes = [8, 128], strides = [1, 1]} : vector<32x128xf32> to vector<8x128xf32>
    %15 = arith.addf %13, %14 : vector<8x128xf32>
    %16 = vector.extract_strided_slice %12 {offsets = [16, 0], sizes = [8, 128], strides = [1, 1]} : vector<32x128xf32> to vector<8x128xf32>
    %17 = arith.addf %15, %16 : vector<8x128xf32>
    %18 = vector.extract_strided_slice %12 {offsets = [24, 0], sizes = [8, 128], strides = [1, 1]} : vector<32x128xf32> to vector<8x128xf32>
    %19 = arith.addf %17, %18 : vector<8x128xf32>
    %20 = arith.truncf %19 : vector<8x128xf32> to vector<8x128xbf16>
    %c0_11 = arith.constant 0 : index
    %c0_12 = arith.constant 0 : index
    %21 = vector.load %arg5[%c0_11, %c0_12] : memref<128x128xbf16, #tpu.memory_space<vmem>>, vector<128x128xbf16>
    %cst_13 = arith.constant dense<0.000000e+00> : vector<8x128xf32>
    %22 = tpu.matmul %20, %21, %cst_13 {dimension_numbers = #tpu.dot_dimension_numbers<[1], [0], [0], [1], [0, 0, 1, 1], [], []>} : vector<8x128xbf16>, vector<128x128xbf16>, vector<8x128xf32> -> vector<8x128xf32>
    %c0_14 = arith.constant 0 : index
    %c0_15 = arith.constant 0 : index
    %23 = vector.load %arg6[%c0_14, %c0_15] : memref<1x128xf32, #tpu.memory_space<vmem>>, vector<1x128xf32>
    %24 = vector.broadcast %23 : vector<1x128xf32> to vector<8x128xf32>
    %25 = arith.addf %22, %24 : vector<8x128xf32>
    %26 = tpu.iota {dimensions = array<i32: 1>} : vector<8x128xi32>
    %c4_i32 = arith.constant 4 : i32
    %27 = vector.broadcast %c4_i32 : i32 to vector<8x128xi32>
    %28 = arith.cmpi slt, %26, %27 : vector<8x128xi32>
    %cst_16 = arith.constant 0xFF800000 : f32
    %29 = vector.broadcast %cst_16 : f32 to vector<8x128xf32>
    %30 = arith.select %28, %25, %29 : vector<8x128xi1>, vector<8x128xf32>
    %cst_17 = arith.constant dense<0xFF800000> : vector<8xf32>
    %31 = vector.multi_reduction <maximumf>, %30, %cst_17 [1] : vector<8x128xf32> to vector<8xf32>
    %32 = vector.shape_cast %31 : vector<8xf32> to vector<8x1xf32>
    %33 = vector.broadcast %32 : vector<8x1xf32> to vector<8x128xf32>
    %34 = arith.subf %25, %33 : vector<8x128xf32>
    %cst_18 = arith.constant 0xFF800000 : f32
    %35 = vector.broadcast %cst_18 : f32 to vector<8x128xf32>
    %36 = arith.select %28, %34, %35 : vector<8x128xi1>, vector<8x128xf32>
    %37 = math.exp %36 : vector<8x128xf32>
    %cst_19 = arith.constant dense<0.000000e+00> : vector<8xf32>
    %38 = vector.multi_reduction <add>, %37, %cst_19 [1] : vector<8x128xf32> to vector<8xf32>
    %39 = vector.shape_cast %38 : vector<8xf32> to vector<8x1xf32>
    %40 = math.log %39 : vector<8x1xf32>
    %41 = vector.broadcast %40 : vector<8x1xf32> to vector<8x128xf32>
    %42 = arith.subf %34, %41 : vector<8x128xf32>
    %c0_20 = arith.constant 0 : index
    %c0_21 = arith.constant 0 : index
    %43 = vector.load %arg7[%c0_20, %c0_21] : memref<8x128xf32, #tpu.memory_space<vmem>>, vector<8x128xf32>
    tpu.vector_store %arg7[%c0_20, %c0_21], %42 {strides = array<i32>} : memref<8x128xf32, #tpu.memory_space<vmem>>, vector<8x128xf32>,
    return
  }
}

</mosaic_0001>

<bundles_post_ra>
// kernel: tpu_custom_call.1
= control target key start
LH: loop header
LB: loop body
LE: loop exit
PB: predicated region body
PF: predicated region fallthrough
CT: control target
= control target key end

     0   :  { %12 = vsyncpa [#allocation3], 0  ;;  %s634_s0 = inlined_call_operand.vmem [shape: f32[32,8], index: 0, kind: input, shape index: {}]   ;;  %s635_s1 = inlined_call_operand.vmem [shape: f32[8,16], index: 1, kind: input, shape index: {}]   ;;  %s636_s2 = inlined_call_operand.hbm [shape: bf16[16,128], index: 2, kind: input, shape index: {}]   ;;  %s637_s3 = inlined_call_operand.vmem [shape: f32[1,128], index: 3, kind: input, shape index: {}]   ;;  %s638_s4 = inlined_call_operand.vmem [shape: f32[32,128], index: 4, kind: input, shape index: {}]   ;;  %s639_s5 = inlined_call_operand.hbm [shape: bf16[128,128], index: 5, kind: input, shape index: {}]   ;;  %s640_s6 = inlined_call_operand.vmem [shape: f32[1,128], index: 6, kind: input, shape index: {}]   ;;  %s641_s7 = inlined_call_operand.hbm [shape: f32[8,128], index: 7, kind: output, shape index: {}]  }
   0x1   :  { %13 = vsyncpa [#allocation6], 0 }
   0x2   :  { %14 = vsyncpa [#allocation4], 0  ;;  %s545_s24 = smov [#allocation2]  }
   0x3   :  { %s24_s25 = sshll.u32 %s545_s24, 4  ;;  %s25_s25 = int_to_ptr.vmem [resolvable:$true] %s24_s25 }
   0x4   :  { %s487_s26 = scalar_lea.vmem %s25_s25, 128  ;;  %p492_p1 = scmp.lt.s32.totalorder %s25_s25, %s25_s25 }
   0x5   :  { %p488_p0 = scmp.ne.s32.totalorder %s25_s25, %s487_s26  ;;  %p493_p2 = scmp.lt.s32.totalorder %s487_s26, %s487_s26 }
   0x7   :  { %p494_p3 = por %p493_p2, %p492_p1 }
   0x9   :  { %p495_p4 = pnand %p494_p3, %p488_p0 }
   0xb   :  { %498 = shalt.err (!%p495_p4)
}
   0xc   :  { %s546_s27 = smov 64   ;;  %s547_s28 = smov 4  }
   0xd   :  { %30 = dma.hbm_to_vmem [thread:$0]  %s636_s2, 128, %s25_s25, [#allocation3], %s546_s27, %s546_s27, %s547_s28  }
   0xe   :  { %s548_s8 = smov [#allocation5]  }
   0xf   :  { %s40_s9 = sshll.u32 %s548_s8, 4  ;;  %s41_s9 = int_to_ptr.vmem [resolvable:$true] %s40_s9 }
  0x10   :  { %s507_s10 = scalar_lea.vmem %s41_s9, 1024  ;;  %p512_p6 = scmp.lt.s32.totalorder %s41_s9, %s41_s9 }
  0x11   :  { %p508_p5 = scmp.ne.s32.totalorder %s41_s9, %s507_s10  ;;  %p513_p7 = scmp.lt.s32.totalorder %s507_s10, %s507_s10 }
  0x13   :  { %p514_p8 = por %p513_p7, %p512_p6 }
  0x15   :  { %p515_p9 = pnand %p514_p8, %p508_p5 }
  0x17   :  { %518 = shalt.err (!%p515_p9)
}
  0x18   :  { %46 = dma.hbm_to_vmem [thread:$0]  %s639_s5, 1024, %s41_s9, [#allocation6], %s546_s27, %s546_s27, %s547_s28  }
  0x19   :  { %539 = dma.done.wait [#allocation3], 128  }
  0x1a   :  { %540 = vsyncadd [#allocation3], 4294967168 }
  0x1b   :  { %541 = dma.done.wait [#allocation6], 1024  }
  0x1c   :  { %542 = vsyncadd [#allocation6], 4294966272  ;;  %vm61_vm0 = vcmask 64512   ;;  %v60_v0 = vld [vmem:[%s635_s1] sm:$0xff]  ;;  %v57_v2 = vld [vmem:[%s634_s0 + $0x8] sm:$0xff]  ;;  %v549_v7 = vmov 0.0   ;;  %v359_v46 = vlaneseq }
  0x1d   :  { %v56_v1 = vld [vmem:[%s634_s0] sm:$0xff]  ;;  %425 = vmatprep.subr.mxu1 %v60_v0  ;;  %v58_v3 = vld [vmem:[%s634_s0 + $0x10] sm:$0xff]  ;;  %v59_v4 = vld [vmem:[%s634_s0 + $0x18] sm:$0xff]  ;;  %439 = vmatprep.subr.bf16.mxu0 %v549_v7  ;;  %vm180_vm1 = vcmask 130048   ;;  %vm550_vm2 = vmmov 0  }
  0x1e   :  { %427 = vmatprep.mubr.msk.f32.mxu1 %vm61_vm0, %v56_v1  ;;  %426 = vmatpush3.msra.mxu1 %v60_v0  ;;  %v466_v5 = vld [vmem:[#allocation2] sm:$0xff]   ;;  %v468_v8 = vld [vmem:[#allocation5 + $0x30] sm:$0xff]   ;;  %v469_v9 = vld [vmem:[#allocation5 + $0x28] sm:$0xff]   ;;  %v360_v47 = vand.u32 127, %v359_v46 }
  0x1f   :  { %428 = vmatmul.mubr.msk.f32.vlgmr.msra.gmra.mxu1 %vm61_vm0, %v57_v2  ;;  %433 = vmatprep.subr.bf16.mxu1 %v466_v5  ;;  %v467_v6 = vld [vmem:[#allocation5 + $0x38] sm:$0xff]   ;;  %v470_v16 = vld [vmem:[#allocation5 + $0x20] sm:$0xff]   ;;  %v472_v18 = vld [vmem:[#allocation5 + $0x10] sm:$0xff]  }
  0x20   :  { %430 = vmatprep.mubr.msk.f32.mxu1 %vm61_vm0, %v58_v3  ;;  %434 = vmatpush3.bf16.msra.mxu1 %v466_v5  ;;  %v471_v17 = vld [vmem:[#allocation5 + $0x18] sm:$0xff]   ;;  %v473_v19 = vld [vmem:[#allocation5 + $0x8] sm:$0xff]   ;;  %v474_v20 = vld [vmem:[#allocation5] sm:$0xff]   ;;  %vm361_vm3 = vcmp.lt.s32.totalorder %v360_v47, 4 }
  0x21   :  { %440 = vmatpush3.bf16.msra.mxu0 %v467_v6  ;;  %455 = vmatprep.mubr.msk.bf16.mxu0 %vm550_vm2, %v549_v7  ;;  %v395_v22 = vld [vmem:[%s637_s3] ss:$0 sm:$0xff]  ;;  %v164_v32 = vld [vmem:[%s638_s4 + $0x8] sm:$0xff]  ;;  %v165_v35 = vld [vmem:[%s638_s4 + $0x10] sm:$0xff] }
  0x22   :  { %441 = vmatprep.subr.bf16.mxu0 %v549_v7  ;;  %v163_v31 = vld [vmem:[%s638_s4] sm:$0xff]  ;;  %v166_v39 = vld [vmem:[%s638_s4 + $0x18] sm:$0xff]  ;;  %s551_s4 = smov [#allocation7]  }
  0x23   :  { %431 = vmatmul.mubr.msk.f32.gmra.mxu1 %vm61_vm0, %v59_v4  ;;  %v399_v48 = vld [vmem:[%s640_s6] ss:$0 sm:$0xff]  ;;  %s381_s6 = sshll.u32 %s551_s4, 4  ;;  %s382_s6 = int_to_ptr.vmem [resolvable:$true] %s381_s6 }
  0x24   :  { %s519_s30 = scalar_lea.vmem %s382_s6, 128  ;;  %p524_p11 = scmp.lt.s32.totalorder %s382_s6, %s382_s6 }
  0x25   :  { %442 = vmatpush3.bf16.msra.mxu0 %v468_v8  ;;  %p520_p10 = scmp.ne.s32.totalorder %s382_s6, %s519_s30  ;;  %p525_p12 = scmp.lt.s32.totalorder %s519_s30, %s519_s30 }
  0x26   :  { %443 = vmatprep.subr.bf16.mxu0 %v549_v7 }
  0x27   :  { %p526_p13 = por %p525_p12, %p524_p11 }
  0x29   :  { %444 = vmatpush3.bf16.msra.mxu0 %v469_v9  ;;  %p527_p0 = pnand %p526_p13, %p520_p10 }
  0x2a   :  { %445 = vmatprep.subr.bf16.mxu0 %v549_v7 }
  0x2d   :  { %446 = vmatpush3.bf16.msra.mxu0 %v470_v16 }
  0x2e   :  { %447 = vmatprep.subr.bf16.mxu0 %v549_v7 }
  0x31   :  { %448 = vmatpush3.bf16.msra.mxu0 %v471_v17 }
  0x32   :  { %449 = vmatprep.subr.bf16.mxu0 %v549_v7 }
  0x35   :  { %450 = vmatpush3.bf16.msra.mxu0 %v472_v18 }
  0x36   :  { %451 = vmatprep.subr.bf16.mxu0 %v549_v7 }
  0x39   :  { %452 = vmatpush3.bf16.msra.mxu0 %v473_v19 }
  0x3a   :  { %453 = vmatprep.subr.bf16.mxu0 %v549_v7 }
  0x3d   :  { %454 = vmatpush3.bf16.msra.mxu0 %v474_v20 }
  0xdf   :  { %v429_v10 = vpop.f32.mrf.mxu1 }
  0xe1   :  { %v140_v11 = vpop.f32.mrf.mxu1 }
  0xe2   :  { %v159_v12 = vpack.c.bf16 %v429_v10, %v140_v11 }
  0xe3   :  { %v432_v13 = vpop.f32.mrf.mxu1 }
  0xe4   :  { %435 = vmatprep.mubr.msk.bf16.mxu1 %vm180_vm1, %v159_v12 }
  0xe5   :  { %v150_v14 = vpop.f32.mrf.mxu1 }
  0xe6   :  { %v160_v15 = vpack.c.bf16 %v432_v13, %v150_v14 }
  0xe8   :  { %436 = vmatmul.mubr.msk.bf16.vlgmr.msra.gmra.mxu1 %vm180_vm1, %v160_v15 }
 0x1a8   :  { %v437_v21 = vpop.f32.mrf.mxu1 }
 0x1a9   :  { %v230_v26 = vadd.f32 %v437_v21, %v395_v22 }
 0x1aa   :  { %v221_v23 = vpop.f32.mrf.mxu1 }
 0x1ab   :  { %v222_v24 = vadd.f32 %v395_v22, %v221_v23  ;;  %v238_v33 = vmax.f32 %v230_v26, 0.0 }
 0x1ac   :  { %v438_v25 = vpop.f32.mrf.mxu1 }
 0x1ad   :  { %v236_v28 = vmax.f32 %v222_v24, 0.0  ;;  %v233_v29 = vadd.f32 %v438_v25, %v395_v22  ;;  %v242_v40 = vmul.f32 %v238_v33, %v165_v35 }
 0x1ae   :  { %v224_v27 = vpop.f32.mrf.mxu1 }
 0x1af   :  { %v225_v30 = vadd.f32 %v395_v22, %v224_v27  ;;  %v240_v36 = vmul.f32 %v236_v28, %v163_v31  ;;  %v239_v37 = vmax.f32 %v233_v29, 0.0 }
 0x1b1   :  { %v237_v34 = vmax.f32 %v225_v30, 0.0  ;;  %v243_v42 = vmul.f32 %v239_v37, %v166_v39 }
 0x1b3   :  { %v241_v38 = vmul.f32 %v237_v34, %v164_v32 }
 0x1b5   :  { %v244_v41 = vadd.f32 %v241_v38, %v240_v36 }
 0x1b7   :  { %v245_v43 = vadd.f32 %v244_v41, %v242_v40 }
 0x1b9   :  { %v246_v44 = vadd.f32 %v245_v43, %v243_v42 }
 0x1bb   :  { %v247_v45 = vpack.c.bf16 %v246_v44, %v246_v44 }
 0x1bd   :  { %456 = vmatmul.mubr.bf16.vlgmr.msra.gmra.mxu0 %v247_v45 }
 0x27d   :  { %v353_v49 = vpop.f32.mrf.mxu0 }
 0x27e   :  { %v354_v50 = vadd.f32 %v399_v48, %v353_v49 }
 0x27f   :  { %v457_v51 = vpop.f32.mrf.mxu0 }
 0x280   :  { %v362_v52 = vsel %vm361_vm3, %v354_v50, -inf }
 0x281   :  { %363 = vmax.xlane.f32.xlu0 %v362_v52  ;;  %v356_v53 = vpop.f32.mrf.mxu0 }
 0x283   :  { %v458_v54 = vpop.f32.mrf.mxu0 }
 0x30a   :  { %v364_v55 = vpop.xlane.xlu0 %363 }
 0x30b   :  { %v365_v56 = vsub.f32 %v354_v50, %v364_v55 }
 0x30d   :  { %v366_v57 = vsel %vm361_vm3, %v365_v56, -inf }
 0x30e   :  { %v367_v58 = vmul.f32 1.442695, %v366_v57 }
 0x310   :  { %475 = vpow2.f32 %v367_v58 }
 0x31d   :  { %v476_v59 = vpop.eup %475 }
 0x31e   :  { %369 = vadd.xlane.f32.xlu0 %v476_v59 }
 0x3a7   :  { %v370_v60 = vpop.xlane.xlu0 %369 }
 0x3a8   :  { %477 = vlog2.f32 %v370_v60 }
 0x3b5   :  { %v478_v61 = vpop.eup %477 }
 0x3b6   :  { %v372_v62 = vmul.f32 0.6931472, %v478_v61 }
 0x3b8   :  { %v373_v63 = vsub.f32 %v365_v56, %v372_v62 }
 0x3ba   :  { %374 = vst [vmem:[#allocation7] sm:$0xff] %v373_v63 }
 0x3bb   :  { %530 = shalt.err (!%p527_p0)
}
 0x3bc   :  { %384 = dma.vmem_to_hbm [thread:$0]  %s382_s6, 128, %s641_s7, [#allocation4]  }
 0x3bd   :  { %543 = dma.done.wait [#allocation4], 128  }
 0x3be   :  { %544 = vsyncadd [#allocation4], 4294967168 }
 0x3bf   :  { %388 = vsyncpa [#allocation3], 1 }
 0x3c0   :  { %389 = vsyncpa [#allocation6], 1 }
 0x3c1   :  { %390 = vsyncpa [#allocation4], 1 }

</bundles_post_ra>
